<compile_context>
chip_gen: v6e
topology: v6e:2x2x1
jax: 0.10.0
libtpu: 0.0.40
codegen_flags: <defaults>
</compile_context>

<pallas_src>
import functools

import jax
import jax.numpy as jnp
from jax.experimental import pallas as pl
from jax.experimental.pallas import tpu as pltpu

LANES = 128
SUBLANES = 8


def _bce_blur_kernel(pred_ref, true_ref, out_ref, acc_ref, *,
                     inv_alpha, tiles_per_split, rows_valid):
    i = pl.program_id(1)  # inner ("arbitrary") reduction axis

    @pl.when(i == 0)
    def _():
        acc_ref[...] = jnp.zeros_like(acc_ref)

    x = pred_ref[...].astype(jnp.float32)   # (tile_rows, 128) logits
    t = true_ref[...].astype(jnp.float32)   # (tile_rows, 128) targets
    tile_rows = x.shape[0]

    # Shared transcendental: e = exp(-|x|), reused for BCE and sigmoid.
    e = jnp.exp(-jnp.abs(x))

    # BCEWithLogitsLoss (reduction='none'), numerically stable form:
    #   max(x, 0) - x*t + log(1 + exp(-|x|))
    bce = jnp.maximum(x, 0.0) - x * t + jnp.log1p(e)

    # sigmoid(x) without a second exp: EUP approx reciprocal + one VPU Newton
    # step restores full f32 precision (do NOT simplify to approx-only).
    den = 1.0 + e
    r = pl.reciprocal(den, approx=True)
    r = r * (2.0 - den * r)
    p = jnp.where(x >= 0.0, r, e * r)

    # Blur factor.
    dx = p - t
    alpha_factor = 1.0 - jnp.exp((dx - 1.0) * inv_alpha)
    loss = bce * alpha_factor

    # Logical tile index over the whole row range (NOT the clamped DMA block
    # index) -> decides whether this tile touches the ragged row tail.
    t_logical = pl.program_id(0) * tiles_per_split + i
    needs_mask = (t_logical + 1) * tile_rows > rows_valid

    @pl.when(jnp.logical_not(needs_mask))
    def _():
        # Fold (tile_rows,128) into an (8,128) vreg-shaped partial sum:
        # layout-compatible reshape, pure VPU vreg adds.
        acc_ref[...] += jnp.sum(loss.reshape(-1, SUBLANES, LANES), axis=0)

    @pl.when(needs_mask)
    def _():
        # Zero rows at/after rows_valid: covers the partial last block (the
        # out-of-bounds part of the read is unspecified data) and any fully
        # padded coverage tiles introduced so the v7x 2-TC split always runs.
        row_ids = jax.lax.broadcasted_iota(jnp.int32, (tile_rows, 1), 0)
        valid = (t_logical * tile_rows + row_ids) < rows_valid
        masked = jnp.where(valid, loss, 0.0)
        acc_ref[...] += jnp.sum(masked.reshape(-1, SUBLANES, LANES), axis=0)

    @pl.when(i == pl.num_programs(1) - 1)
    def _():
        out_ref[...] = acc_ref[...]   # lane-dense (8,128) partial sum


def bce_blur_with_logits_loss(pred, true, alpha=0.05, tile_rows=4096):
    """Pallas implementation of BCEBlurWithLogitsLoss.forward -> scalar mean."""
    assert pred.shape == true.shape
    n_valid = int(pred.size)
    assert n_valid > 0

    itemsize = jnp.dtype(pred.dtype).itemsize

    pred_flat = pred.reshape(-1)
    true_flat = true.reshape(-1)

    rem = n_valid % LANES
    if rem != 0:
        # Only for element counts not divisible by 128: pad the <=127-element
        # lane tail with a finite sentinel (pred=-100, true=0) whose loss is
        # ~4e-44 per element (negligible).  The 128-aligned path is zero-copy.
        pad = LANES - rem
        pred_flat = jnp.concatenate(
            [pred_flat, jnp.full((pad,), -100.0, dtype=pred.dtype)])
        true_flat = jnp.concatenate(
            [true_flat, jnp.zeros((pad,), dtype=true.dtype)])

    rows_valid = pred_flat.shape[0] // LANES        # real rows in the 2-D view
    pred2d = pred_flat.reshape(rows_valid, LANES)   # free reshape, native dtype
    true2d = true_flat.reshape(rows_valid, LANES)

    # Generation-safe VMEM budget: clamp the tile by the f32-intermediate
    # footprint (inputs double-buffered in native dtype + ~10 block-sized f32
    # temporaries in the elementwise chain), not the native itemsize.
    budget = 30 * 1024 * 1024
    per_row_bytes = LANES * (2 * 2 * itemsize + 10 * 4)
    max_tile_rows = (budget // per_row_bytes // SUBLANES) * SUBLANES
    tile_rows = max(SUBLANES, min(int(tile_rows), int(max_tile_rows)))
    tile_rows = (tile_rows // SUBLANES) * SUBLANES
    # Shrink to the data for small inputs (one partial block, no padding).
    tile_rows = min(tile_rows, pl.cdiv(rows_valid, SUBLANES) * SUBLANES)

    num_real_blocks = pl.cdiv(rows_valid, tile_rows)
    # Always engage the 2-TensorCore split (v7x) when there is more than one
    # tile; odd counts are rounded up and the extra tiles are masked in-kernel.
    # Harmless on v5e/v6e (single TC -> just a 2-iteration serial outer loop).
    n_split = 2 if num_real_blocks >= 2 else 1
    tiles_per_split = pl.cdiv(num_real_blocks, n_split)

    est_vmem = (2 * 2 * tile_rows * LANES * itemsize
                + 10 * tile_rows * LANES * 4)
    vmem_limit = int(min(max(est_vmem + (8 << 20), 24 << 20), 48 << 20))

    kernel = functools.partial(
        _bce_blur_kernel,
        inv_alpha=1.0 / (alpha + 0.0001),
        tiles_per_split=tiles_per_split,
        rows_valid=rows_valid)

    last_block = num_real_blocks - 1
    # Clamp the DMA block index so over-coverage tiles re-read the last real
    # block (never a fully out-of-bounds transfer); the in-kernel mask uses
    # the logical tile index, so nothing is double counted.
    in_map = lambda c, i: (jnp.minimum(c * tiles_per_split + i, last_block), 0)

    n_elems = rows_valid * LANES
    cost = pl.CostEstimate(
        flops=16 * n_elems,
        transcendentals=4 * n_elems,
        bytes_accessed=2 * n_elems * itemsize + n_split * SUBLANES * LANES * 4,
    )

    partials = pl.pallas_call(
        kernel,
        out_shape=jax.ShapeDtypeStruct((n_split * SUBLANES, LANES), jnp.float32),
        grid_spec=pltpu.PrefetchScalarGridSpec(
            num_scalar_prefetch=0,
            grid=(n_split, tiles_per_split),
            in_specs=[
                pl.BlockSpec((tile_rows, LANES), in_map),
                pl.BlockSpec((tile_rows, LANES), in_map),
            ],
            out_specs=pl.BlockSpec((SUBLANES, LANES), lambda c, i: (c, 0)),
            scratch_shapes=[pltpu.VMEM((SUBLANES, LANES), jnp.float32)],
        ),
        compiler_params=pltpu.CompilerParams(
            dimension_semantics=("parallel", "arbitrary"),
            vmem_limit_bytes=vmem_limit),
        cost_estimate=cost,
    )(pred2d, true2d)

    # Exact mean over the ORIGINAL element count, applied in the wrapper.
    return jnp.sum(partials) / n_valid


def _reference(pred, true, alpha=0.05):
    x = pred.astype(jnp.float32)
    t = true.astype(jnp.float32)
    bce = jnp.maximum(x, 0.0) - x * t + jnp.log1p(jnp.exp(-jnp.abs(x)))
    p = jax.nn.sigmoid(x)
    dx = p - t
    af = 1.0 - jnp.exp((dx - 1.0) / (alpha + 0.0001))
    return jnp.mean(bce * af)


if __name__ == "__main__":
    key = jax.random.PRNGKey(0)
    k1, k2 = jax.random.split(key)
    # Shapes consistent with a YOLO-style prediction tensor (NCHW).
    x_shape = (2, 4, 16, 16)
    pred = jax.random.normal(k1, x_shape, dtype=jnp.float32)
    true = (jax.random.uniform(k2, x_shape) > 0.5).astype(jnp.float32)

    loss = bce_blur_with_logits_loss(pred, true, alpha=0.05)
    loss = jax.block_until_ready(loss)

    ref = _reference(pred, true, alpha=0.05)
    assert jnp.allclose(loss, ref, rtol=1e-5, atol=1e-5), (loss, ref)
    print("KERNEL_OK")
</pallas_src>

<mosaic_0001>
module attributes {stable_mosaic.version = 11 : i64} {
  func.func @_bce_blur_kernel(%arg0: i32, %arg1: i32, %arg2: memref<16x128xf32, #tpu.memory_space<vmem>>, %arg3: memref<16x128xf32, #tpu.memory_space<vmem>>, %arg4: memref<8x128xf32, #tpu.memory_space<vmem>>, %arg5: memref<8x128xf32, #tpu.memory_space<vmem>>) attributes {dimension_semantics = [#tpu.dimension_semantics<parallel>, #tpu.dimension_semantics<arbitrary>], iteration_bounds = array<i64: 1, 1>, scalar_prefetch = 0 : i64, scratch_operands = 1 : i64, tpu.core_type = #tpu.core_type<tc>, window_params = [{transform_indices = @transform_0, window_bounds = array<i64: 16, 128>}, {transform_indices = @transform_1, window_bounds = array<i64: 16, 128>}, {transform_indices = @transform_2, window_bounds = array<i64: 8, 128>}]} {
    %c0_i32 = arith.constant 0 : i32
    %0 = arith.cmpi eq, %arg1, %c0_i32 : i32
    %1 = arith.extui %0 : i1 to i32
    %c0_i32_0 = arith.constant 0 : i32
    %2 = arith.cmpi ne, %1, %c0_i32_0 : i32
    scf.if %2 {
      %cst_17 = arith.constant 0.000000e+00 : f32
      %48 = vector.broadcast %cst_17 : f32 to vector<8x128xf32>
      %c0_18 = arith.constant 0 : index
      %c0_19 = arith.constant 0 : index
      %49 = vector.load %arg5[%c0_18, %c0_19] : memref<8x128xf32, #tpu.memory_space<vmem>>, vector<8x128xf32>
      tpu.vector_store %arg5[%c0_18, %c0_19], %48 {strides = array<i32>} : memref<8x128xf32, #tpu.memory_space<vmem>>, vector<8x128xf32>,
    } else {
    }
    %c0 = arith.constant 0 : index
    %c0_1 = arith.constant 0 : index
    %3 = vector.load %arg2[%c0, %c0_1] : memref<16x128xf32, #tpu.memory_space<vmem>>, vector<16x128xf32>
    %c0_2 = arith.constant 0 : index
    %c0_3 = arith.constant 0 : index
    %4 = vector.load %arg3[%c0_2, %c0_3] : memref<16x128xf32, #tpu.memory_space<vmem>>, vector<16x128xf32>
    %5 = math.absf %3 : vector<16x128xf32>
    %cst = arith.constant 0.000000e+00 : f32
    %6 = vector.broadcast %cst : f32 to vector<16x128xf32>
    %7 = arith.subf %6, %5 : vector<16x128xf32>
    %8 = math.exp %7 : vector<16x128xf32>
    %cst_4 = arith.constant 0.000000e+00 : f32
    %9 = vector.broadcast %cst_4 : f32 to vector<16x128xf32>
    %10 = arith.maximumf %3, %9 : vector<16x128xf32>
    %11 = arith.mulf %3, %4 : vector<16x128xf32>
    %12 = arith.subf %10, %11 : vector<16x128xf32>
    %13 = math.log1p %8 : vector<16x128xf32>
    %14 = arith.addf %12, %13 : vector<16x128xf32>
    %cst_5 = arith.constant 1.000000e+00 : f32
    %15 = vector.broadcast %cst_5 : f32 to vector<16x128xf32>
    %16 = arith.addf %15, %8 : vector<16x128xf32>
    %17 = tpu.reciprocal %16 {approx = true} : vector<16x128xf32> -> vector<16x128xf32>
    %18 = arith.mulf %16, %17 : vector<16x128xf32>
    %cst_6 = arith.constant 2.000000e+00 : f32
    %19 = vector.broadcast %cst_6 : f32 to vector<16x128xf32>
    %20 = arith.subf %19, %18 : vector<16x128xf32>
    %21 = arith.mulf %17, %20 : vector<16x128xf32>
    %cst_7 = arith.constant 0.000000e+00 : f32
    %22 = vector.broadcast %cst_7 : f32 to vector<16x128xf32>
    %23 = arith.cmpf oge, %3, %22 : vector<16x128xf32>
    %24 = arith.mulf %8, %21 : vector<16x128xf32>
    %25 = arith.select %23, %21, %24 : vector<16x128xi1>, vector<16x128xf32>
    %26 = arith.subf %25, %4 : vector<16x128xf32>
    %cst_8 = arith.constant 1.000000e+00 : f32
    %27 = vector.broadcast %cst_8 : f32 to vector<16x128xf32>
    %28 = arith.subf %26, %27 : vector<16x128xf32>
    %cst_9 = arith.constant 19.9600792 : f32
    %29 = vector.broadcast %cst_9 : f32 to vector<16x128xf32>
    %30 = arith.mulf %28, %29 : vector<16x128xf32>
    %31 = math.exp %30 : vector<16x128xf32>
    %cst_10 = arith.constant 1.000000e+00 : f32
    %32 = vector.broadcast %cst_10 : f32 to vector<16x128xf32>
    %33 = arith.subf %32, %31 : vector<16x128xf32>
    %34 = arith.mulf %14, %33 : vector<16x128xf32>
    %c1_i32 = arith.constant 1 : i32
    %35 = arith.muli %arg0, %c1_i32 : i32
    %36 = arith.addi %35, %arg1 : i32
    %c1_i32_11 = arith.constant 1 : i32
    %37 = arith.addi %36, %c1_i32_11 : i32
    %c16_i32 = arith.constant 16 : i32
    %38 = arith.muli %37, %c16_i32 : i32
    %c16_i32_12 = arith.constant 16 : i32
    %39 = arith.cmpi sgt, %38, %c16_i32_12 : i32
    %true = arith.constant true
    %40 = arith.xori %39, %true : i1
    %41 = arith.extui %40 : i1 to i32
    %c0_i32_13 = arith.constant 0 : i32
    %42 = arith.cmpi ne, %41, %c0_i32_13 : i32
    scf.if %42 {
      %c0_17 = arith.constant 0 : index
      %c0_18 = arith.constant 0 : index
      %48 = vector.load %arg5[%c0_17, %c0_18] : memref<8x128xf32, #tpu.memory_space<vmem>>, vector<8x128xf32>
      %49 = vector.shape_cast %34 : vector<16x128xf32> to vector<2x8x128xf32>
      %cst_19 = arith.constant dense<0.000000e+00> : vector<8x128xf32>
      %50 = vector.multi_reduction <add>, %49, %cst_19 [0] : vector<2x8x128xf32> to vector<8x128xf32>
      %51 = arith.addf %48, %50 : vector<8x128xf32>
      %c0_20 = arith.constant 0 : index
      %c0_21 = arith.constant 0 : index
      %52 = vector.load %arg5[%c0_20, %c0_21] : memref<8x128xf32, #tpu.memory_space<vmem>>, vector<8x128xf32>
      tpu.vector_store %arg5[%c0_20, %c0_21], %51 {strides = array<i32>} : memref<8x128xf32, #tpu.memory_space<vmem>>, vector<8x128xf32>,
    } else {
    }
    %43 = arith.extui %39 : i1 to i32
    %c0_i32_14 = arith.constant 0 : i32
    %44 = arith.cmpi ne, %43, %c0_i32_14 : i32
    scf.if %44 {
      %48 = tpu.iota {dimensions = array<i32: 0>} : vector<16x1xi32>
      %c16_i32_17 = arith.constant 16 : i32
      %49 = arith.muli %36, %c16_i32_17 : i32
      %50 = vector.broadcast %49 : i32 to vector<16x1xi32>
      %51 = arith.addi %50, %48 : vector<16x1xi32>
      %c16_i32_18 = arith.constant 16 : i32
      %52 = vector.broadcast %c16_i32_18 : i32 to vector<16x1xi32>
      %53 = arith.cmpi slt, %51, %52 : vector<16x1xi32>
      %cst_19 = arith.constant 0.000000e+00 : f32
      %54 = vector.shape_cast %53 : vector<16x1xi1> to vector<16x1xi1>
      %55 = vector.broadcast %54 : vector<16x1xi1> to vector<16x128xi1>
      %56 = vector.broadcast %cst_19 : f32 to vector<16x128xf32>
      %57 = arith.select %55, %34, %56 : vector<16x128xi1>, vector<16x128xf32>
      %c0_20 = arith.constant 0 : index
      %c0_21 = arith.constant 0 : index
      %58 = vector.load %arg5[%c0_20, %c0_21] : memref<8x128xf32, #tpu.memory_space<vmem>>, vector<8x128xf32>
      %59 = vector.shape_cast %57 : vector<16x128xf32> to vector<2x8x128xf32>
      %cst_22 = arith.constant dense<0.000000e+00> : vector<8x128xf32>
      %60 = vector.multi_reduction <add>, %59, %cst_22 [0] : vector<2x8x128xf32> to vector<8x128xf32>
      %61 = arith.addf %58, %60 : vector<8x128xf32>
      %c0_23 = arith.constant 0 : index
      %c0_24 = arith.constant 0 : index
      %62 = vector.load %arg5[%c0_23, %c0_24] : memref<8x128xf32, #tpu.memory_space<vmem>>, vector<8x128xf32>
      tpu.vector_store %arg5[%c0_23, %c0_24], %61 {strides = array<i32>} : memref<8x128xf32, #tpu.memory_space<vmem>>, vector<8x128xf32>,
    } else {
    }
    %c0_i32_15 = arith.constant 0 : i32
    %45 = arith.cmpi eq, %arg1, %c0_i32_15 : i32
    %46 = arith.extui %45 : i1 to i32
    %c0_i32_16 = arith.constant 0 : i32
    %47 = arith.cmpi ne, %46, %c0_i32_16 : i32
    scf.if %47 {
      %c0_17 = arith.constant 0 : index
      %c0_18 = arith.constant 0 : index
      %48 = vector.load %arg5[%c0_17, %c0_18] : memref<8x128xf32, #tpu.memory_space<vmem>>, vector<8x128xf32>
      %c0_19 = arith.constant 0 : index
      %c0_20 = arith.constant 0 : index
      %49 = vector.load %arg4[%c0_19, %c0_20] : memref<8x128xf32, #tpu.memory_space<vmem>>, vector<8x128xf32>
      tpu.vector_store %arg4[%c0_19, %c0_20], %48 {strides = array<i32>} : memref<8x128xf32, #tpu.memory_space<vmem>>, vector<8x128xf32>,
    } else {
    }
    return
  }
  func.func @transform_0(%arg0: i32, %arg1: i32) -> (i32, i32) {
    %c1_i32 = arith.constant 1 : i32
    %0 = arith.muli %arg0, %c1_i32 : i32
    %1 = arith.addi %0, %arg1 : i32
    %c0_i32 = arith.constant 0 : i32
    %2 = arith.minsi %1, %c0_i32 : i32
    %c0_i32_0 = arith.constant 0 : i32
    %c0_i32_1 = arith.constant 0 : i32
    return %2, %c0_i32_0 : i32, i32
  }
  func.func @transform_1(%arg0: i32, %arg1: i32) -> (i32, i32) {
    %c1_i32 = arith.constant 1 : i32
    %0 = arith.muli %arg0, %c1_i32 : i32
    %1 = arith.addi %0, %arg1 : i32
    %c0_i32 = arith.constant 0 : i32
    %2 = arith.minsi %1, %c0_i32 : i32
    %c0_i32_0 = arith.constant 0 : i32
    %c0_i32_1 = arith.constant 0 : i32
    return %2, %c0_i32_0 : i32, i32
  }
  func.func @transform_2(%arg0: i32, %arg1: i32) -> (i32, i32) {
    %c0_i32 = arith.constant 0 : i32
    %c0_i32_0 = arith.constant 0 : i32
    return %arg0, %c0_i32 : i32, i32
  }
}

</mosaic_0001>

<bundles_post_ra>
// kernel: tpu_custom_call.1
= control target key start
LH: loop header
LB: loop body
LE: loop exit
PB: predicated region body
PF: predicated region fallthrough
CT: control target
= control target key end

     0   :  { %7 = vsyncpa [#allocation4], 0  ;;  %s322_s0 = inlined_call_operand.hbm [shape: f32[16,128], index: 0, kind: input, shape index: {}]   ;;  %s323_s1 = inlined_call_operand.hbm [shape: f32[16,128], index: 1, kind: input, shape index: {}]   ;;  %s324_s2 = inlined_call_operand.hbm [shape: f32[8,128], index: 2, kind: output, shape index: {}]  }
   0x1   :  { %8 = vsyncpa [#allocation7], 0 }
   0x2   :  { %9 = vsyncpa [#allocation5], 0  ;;  %s281_s9 = smov [#allocation3]  }
   0x3   :  { %s21_s10 = sshll.u32 %s281_s9, 4  ;;  %s22_s10 = int_to_ptr.vmem [resolvable:$true] %s21_s10 }
   0x4   :  { %s223_s11 = scalar_lea.vmem %s22_s10, 256  ;;  %p228_p1 = scmp.lt.s32.totalorder %s22_s10, %s22_s10 }
   0x5   :  { %p224_p0 = scmp.ne.s32.totalorder %s22_s10, %s223_s11  ;;  %p229_p2 = scmp.lt.s32.totalorder %s223_s11, %s223_s11 }
   0x7   :  { %p230_p3 = por %p229_p2, %p228_p1 }
   0x9   :  { %p231_p4 = pnand %p230_p3, %p224_p0 }
   0xb   :  { %234 = shalt.err (!%p231_p4)
}
   0xc   :  { %s282_s12 = smov 128   ;;  %s283_s13 = smov 8  }
   0xd   :  { %27 = dma.hbm_to_vmem [thread:$0]  %s322_s0, 256, %s22_s10, [#allocation4], %s282_s12, %s282_s12, %s283_s13  }
   0xe   :  { %s284_s16 = smov [#allocation6]  }
   0xf   :  { %s39_s17 = sshll.u32 %s284_s16, 4  ;;  %s40_s17 = int_to_ptr.vmem [resolvable:$true] %s39_s17 }
  0x10   :  { %s243_s18 = scalar_lea.vmem %s40_s17, 256  ;;  %p248_p6 = scmp.lt.s32.totalorder %s40_s17, %s40_s17 }
  0x11   :  { %p244_p5 = scmp.ne.s32.totalorder %s40_s17, %s243_s18  ;;  %p249_p7 = scmp.lt.s32.totalorder %s243_s18, %s243_s18 }
  0x13   :  { %p250_p8 = por %p249_p7, %p248_p6 }
  0x15   :  { %p251_p9 = pnand %p250_p8, %p244_p5 }
  0x17   :  { %254 = shalt.err (!%p251_p9)
}
  0x18   :  { %45 = dma.hbm_to_vmem [thread:$0]  %s323_s1, 256, %s40_s17, [#allocation7], %s282_s12, %s282_s12, %s283_s13  }
  0x19   :  { %275 = dma.done.wait [#allocation4], 256  }
  0x1a   :  { %276 = vsyncadd [#allocation4], 4294967040 }
  0x1b   :  { %277 = dma.done.wait [#allocation7], 256  }
  0x1c   :  { %278 = vsyncadd [#allocation7], 4294967040  ;;  %v307_v0 = vld [vmem:[#allocation3] sm:$0xff]  ;;  %v309_v1 = vld [vmem:[#allocation3 + $0x8] sm:$0xff]  ;;  %s285_s0 = smov [#allocation8]  }
  0x1d   :  { %v69_v2 = vand.u32 2147483647, %v307_v0  ;;  %v70_v3 = vand.u32 2147483647, %v309_v1  ;;  %vm113_vm0 = vcmp.ge.f32.partialorder %v307_v0, 0.0  ;;  %v67_v20 = vld [vmem:[#allocation6] sm:$0xff] }
  0x1e   :  { %vm114_vm1 = vcmp.ge.f32.partialorder %v309_v1, 0.0  ;;  %v68_v22 = vld [vmem:[#allocation6 + $0x8] sm:$0xff]  ;;  %v77_v42 = vmax.f32 %v307_v0, 0.0  ;;  %v79_v43 = vmul.f32 %v67_v20, %v307_v0  ;;  %v78_v44 = vmax.f32 %v309_v1, 0.0  ;;  %s178_s1 = sshll.u32 %s285_s0, 4  ;;  %s179_s1 = int_to_ptr.vmem [resolvable:$true] %s178_s1 }
  0x1f   :  { %v71_v4 = vsub.f32 0.0, %v69_v2  ;;  %v72_v5 = vsub.f32 0.0, %v70_v3  ;;  %v80_v45 = vmul.f32 %v68_v22, %v309_v1  ;;  %s255_s21 = scalar_lea.vmem %s179_s1, 128  ;;  %p260_p11 = scmp.lt.s32.totalorder %s179_s1, %s179_s1 }
  0x20   :  { %v81_v50 = vsub.f32 %v77_v42, %v79_v43  ;;  %p256_p10 = scmp.ne.s32.totalorder %s179_s1, %s255_s21  ;;  %p261_p12 = scmp.lt.s32.totalorder %s255_s21, %s255_s21 }
  0x21   :  { %v73_v6 = vmul.f32 1.442695, %v71_v4  ;;  %v75_v7 = vmul.f32 1.442695, %v72_v5  ;;  %v82_v51 = vsub.f32 %v78_v44, %v80_v45 }
  0x22   :  { %p262_p13 = por %p261_p12, %p260_p11 }
  0x23   :  { %199 = vpow2.f32 %v73_v6 }
  0x24   :  { %201 = vpow2.f32 %v75_v7  ;;  %p263_p0 = pnand %p262_p13, %p256_p10 }
  0x30   :  { %v200_v8 = vpop.eup %199 }
  0x31   :  { %v202_v9 = vpop.eup %201  ;;  %v83_v10 = vadd.f32 1.0, %v200_v8  ;;  %v86_v31 = vmul.f32 -0.5, %v200_v8  ;;  %v89_v38 = vand.u32 2147483647, %v200_v8 }
  0x32   :  { %v92_v11 = vadd.f32 1.0, %v202_v9  ;;  %v95_v33 = vmul.f32 -0.5, %v202_v9  ;;  %v98_v41 = vand.u32 2147483647, %v202_v9 }
  0x33   :  { %203 = vrcp.f32 %v83_v10  ;;  %v87_v36 = vadd.f32 1.0, %v86_v31  ;;  %vm90_vm2 = vcmp.lt.f32.partialorder %v89_v38, 0.0004427343 }
  0x34   :  { %205 = vrcp.f32 %v92_v11  ;;  %v96_v39 = vadd.f32 1.0, %v95_v33  ;;  %vm99_vm3 = vcmp.lt.f32.partialorder %v98_v41, 0.0004427343 }
  0x35   :  { %207 = vlog2.f32 %v83_v10  ;;  %v88_v47 = vmul.f32 %v200_v8, %v87_v36 }
  0x36   :  { %209 = vlog2.f32 %v92_v11  ;;  %v97_v49 = vmul.f32 %v202_v9, %v96_v39 }
  0x40   :  { %v204_v12 = vpop.eup %203 }
  0x41   :  { %v206_v13 = vpop.eup %205  ;;  %v107_v14 = vmul.f32 %v204_v12, %v83_v10 }
  0x42   :  { %v108_v15 = vmul.f32 %v206_v13, %v92_v11  ;;  %v208_v37 = vpop.eup %207 }
  0x43   :  { %v109_v16 = vsub.f32 2.0, %v107_v14  ;;  %v210_v40 = vpop.eup %209  ;;  %v85_v46 = vmul.f32 0.6931472, %v208_v37 }
  0x44   :  { %v110_v17 = vsub.f32 2.0, %v108_v15  ;;  %v94_v48 = vmul.f32 0.6931472, %v210_v40 }
  0x45   :  { %v111_v18 = vmul.f32 %v204_v12, %v109_v16  ;;  %v91_v52 = vsel %vm90_vm2, %v88_v47, %v85_v46 }
  0x46   :  { %v112_v19 = vmul.f32 %v206_v13, %v110_v17  ;;  %v100_v53 = vsel %vm99_vm3, %v97_v49, %v94_v48  ;;  %v101_v54 = vadd.f32 %v91_v52, %v81_v50 }
  0x47   :  { %v115_v21 = vmul.f32 %v200_v8, %v111_v18  ;;  %v102_v56 = vadd.f32 %v100_v53, %v82_v51 }
  0x48   :  { %v116_v23 = vmul.f32 %v202_v9, %v112_v19 }
  0x49   :  { %v117_v24 = vsel %vm113_vm0, %v111_v18, %v115_v21 }
  0x4a   :  { %v118_v25 = vsel %vm114_vm1, %v112_v19, %v116_v23  ;;  %v119_v26 = vsub.f32 %v117_v24, %v67_v20 }
  0x4b   :  { %v120_v27 = vsub.f32 %v118_v25, %v68_v22 }
  0x4c   :  { %v192_v28 = vadd.f32 -1.0, %v119_v26 }
  0x4d   :  { %v193_v29 = vadd.f32 -1.0, %v120_v27 }
  0x4e   :  { %v123_v30 = vmul.f32 19.96008, %v192_v28 }
  0x4f   :  { %v124_v32 = vmul.f32 19.96008, %v193_v29 }
  0x50   :  { %v125_v34 = vmul.f32 1.442695, %v123_v30 }
  0x51   :  { %v127_v35 = vmul.f32 1.442695, %v124_v32 }
  0x52   :  { %211 = vpow2.f32 %v125_v34 }
  0x53   :  { %213 = vpow2.f32 %v127_v35 }
  0x5f   :  { %v212_v55 = vpop.eup %211 }
  0x60   :  { %v214_v57 = vpop.eup %213  ;;  %v129_v58 = vsub.f32 1.0, %v212_v55 }
  0x61   :  { %v130_v59 = vsub.f32 1.0, %v214_v57 }
  0x62   :  { %v131_v60 = vmul.f32 %v129_v58, %v101_v54 }
  0x63   :  { %v132_v61 = vmul.f32 %v130_v59, %v102_v56 }
  0x65   :  { %v142_v62 = vadd.f32 %v132_v61, %v131_v60 }
  0x67   :  { %171 = vst [vmem:[#allocation8] sm:$0xff] %v142_v62 }
  0x68   :  { %266 = shalt.err (!%p263_p0)
}
  0x69   :  { %181 = dma.vmem_to_hbm [thread:$0]  %s179_s1, 128, %s324_s2, [#allocation5]  }
  0x6a   :  { %279 = dma.done.wait [#allocation5], 128  }
  0x6b   :  { %280 = vsyncadd [#allocation5], 4294967168 }
  0x6c   :  { %185 = vsyncpa [#allocation4], 1 }
  0x6d   :  { %186 = vsyncpa [#allocation7], 1 }
  0x6e   :  { %187 = vsyncpa [#allocation5], 1 }

</bundles_post_ra>
